<compile_context>
chip_gen: v7x
topology: tpu7x:2x2x1
jax: 0.10.0
libtpu: 0.0.40
codegen_flags: <defaults>
</compile_context>

<pallas_src>
import jax
import jax.numpy as jnp
from jax.experimental import pallas as pl
from jax.experimental.pallas import tpu as pltpu


_LANE = 128
_SUBLANE = 8
_MIN_SPLIT_ROWS = 1024   # only force a 2-way megacore split above this many rows


def _round_up(v, m):
    return -(-v // m) * m


def _vmem_capacity_bytes():
    """Per-TensorCore VMEM capacity; conservative fallback = v7x's 64 MiB."""
    try:
        cap = getattr(pltpu.get_tpu_info(), "vmem_capacity_bytes", None)
        if cap:
            return int(cap)
    except Exception:
        pass
    return 64 * 1024 * 1024


def _pick_tile_b(batch, n_features, itemsize, per_buffer_budget_bytes):
    """Largest batch tile whose *padded* VMEM footprint (x block + output
    block, each lane-padded to a multiple of 128) fits one buffer's budget.
    Double buffering is handled by the caller passing half the total
    streaming budget per buffer."""
    padded_f = _round_up(n_features, _LANE)
    # one x row (lane-padded) + one (tile_b, 1) output row (padded to 128 lanes)
    bytes_per_row = (padded_f + _LANE) * itemsize
    rows = per_buffer_budget_bytes // bytes_per_row
    rows = max(_SUBLANE, (rows // _SUBLANE) * _SUBLANE)   # sublane rule: multiple of 8
    tile_b = min(batch, rows)
    # v7x megacore: keep >= 2 grid steps for large batches so the "parallel"
    # axis actually shards across the 2 TensorCores.
    if tile_b >= batch and batch >= 2 * _MIN_SPLIT_ROWS:
        tile_b = min(tile_b, _round_up(-(-batch // 2), _SUBLANE))
    if tile_b >= batch:
        tile_b = batch   # block equal to the full dim is always legal
    return int(tile_b)


def _logreg_kernel(x_ref, w_ref, b_ref, o_ref):
    # x_ref: (tile_b, F) VMEM, w_ref: (1, F) VMEM, b_ref: (1,) SMEM, o_ref: (tile_b, 1)
    prod = x_ref[...] * w_ref[...]                     # VPU, weight row broadcast over sublanes
    z = jnp.sum(prod, axis=-1, keepdims=True)          # XLU lane reduce -> (tile_b, 1)
    z = z + b_ref[0]                                   # SMEM scalar bias
    e = jnp.exp(-z)                                    # EUP
    o_ref[...] = (1.0 / (1.0 + e)).astype(o_ref.dtype)  # exact sigmoid (VPU divide)


def logistic_regression_forward(x, weight, bias, *, x_buffer_budget_bytes=None):
    """x: (B, F); weight: (1, F) (PyTorch nn.Linear layout); bias: (1,) -> (B, 1)."""
    B, F = x.shape
    assert weight.shape == (1, F) and bias.shape == (1,)
    itemsize = jnp.dtype(x.dtype).itemsize

    vmem_cap = _vmem_capacity_bytes()
    if x_buffer_budget_bytes is None:
        # Quarter of VMEM per in-flight (x + out) buffer; double-buffered ->
        # half of VMEM for the stream: 32 MiB/buffer on v5e/v6e, 16 MiB on v7x.
        x_buffer_budget_bytes = vmem_cap // 4

    tile_b = _pick_tile_b(B, F, itemsize, x_buffer_budget_bytes)
    # TODO(synk): feature-dim tiling for F so large that even an 8-row block
    # overflows VMEM (not reachable for realistic logistic-regression widths).

    padded_f = _round_up(F, _LANE)
    tile_rows = _round_up(tile_b, _SUBLANE)
    tile_footprint = tile_rows * (padded_f + _LANE) * itemsize   # padded x + out block
    vmem_limit = min(2 * tile_footprint + (8 << 20), (vmem_cap * 3) // 4)
    vmem_limit = max(vmem_limit, 32 << 20)

    return pl.pallas_call(
        _logreg_kernel,
        out_shape=jax.ShapeDtypeStruct((B, 1), x.dtype),
        grid_spec=pl.GridSpec(
            grid=(pl.cdiv(B, tile_b),),
            in_specs=[
                pl.BlockSpec((tile_b, F), lambda i: (i, 0)),        # x: batch-tiled, pipelined
                pl.BlockSpec((1, F), lambda i: (0, 0)),             # weight: lane-dense, resident
                pl.BlockSpec(memory_space=pltpu.MemorySpace.SMEM),  # bias scalar in SMEM
            ],
            out_specs=pl.BlockSpec((tile_b, 1), lambda i: (i, 0)),
        ),
        compiler_params=pltpu.CompilerParams(
            dimension_semantics=("parallel",),       # shard batch tiles across TCs (v7x)
            vmem_limit_bytes=int(vmem_limit),        # sized from the padded tile footprint
        ),
    )(x, weight, bias)


def _reference(x, weight, bias):
    # Same math as sigmoid(x @ W.T + b) without TPU matmul default-precision noise.
    return jax.nn.sigmoid(jnp.sum(x * weight, axis=-1, keepdims=True) + bias)


if __name__ == "__main__":
    n_features = 32
    batch = 8

    key = jax.random.PRNGKey(0)
    kx, kw, kb = jax.random.split(key, 3)

    # Deterministic parameter init (mimics nn.Linear uniform(-1/sqrt(F), 1/sqrt(F)))
    bound = 1.0 / jnp.sqrt(jnp.float32(n_features))
    x = jax.random.normal(kx, (batch, n_features), dtype=jnp.float32)
    weight = jax.random.uniform(kw, (1, n_features), minval=-bound, maxval=bound,
                                dtype=jnp.float32)
    bias = jax.random.uniform(kb, (1,), minval=-bound, maxval=bound, dtype=jnp.float32)

    # Small-shape run (single full-array tile).
    out = jax.block_until_ready(logistic_regression_forward(x, weight, bias))
    ref = _reference(x, weight, bias)
    assert out.shape == (batch, 1)
    assert jnp.allclose(out, ref, atol=1e-5, rtol=1e-5), "mismatch vs reference (small)"

    # Multi-tile pipelined path with a ragged final tile (small budget forces tiling).
    batch2 = 1000
    x2 = jax.random.normal(kx, (batch2, n_features), dtype=jnp.float32)
    out2 = jax.block_until_ready(
        logistic_regression_forward(x2, weight, bias, x_buffer_budget_bytes=256 * 1024))
    ref2 = _reference(x2, weight, bias)
    assert out2.shape == (batch2, 1)
    assert jnp.allclose(out2, ref2, atol=1e-5, rtol=1e-5), "mismatch vs reference (tiled)"

    # Megacore-split path: one byte-sized tile would cover the whole batch,
    # so the wrapper halves it to keep >= 2 "parallel" grid steps.
    batch3 = 4096
    x3 = jax.random.normal(kx, (batch3, n_features), dtype=jnp.float32)
    out3 = jax.block_until_ready(logistic_regression_forward(x3, weight, bias))
    ref3 = _reference(x3, weight, bias)
    assert out3.shape == (batch3, 1)
    assert jnp.allclose(out3, ref3, atol=1e-5, rtol=1e-5), "mismatch vs reference (split)"

    print("KERNEL_OK")
</pallas_src>

<mosaic_0001>
module attributes {stable_mosaic.version = 11 : i64} {
  func.func @_logreg_kernel(%arg0: i32, %arg1: memref<8x32xf32, #tpu.memory_space<vmem>>, %arg2: memref<1x32xf32, #tpu.memory_space<vmem>>, %arg3: memref<1xf32, #tpu.memory_space<smem>>, %arg4: memref<8x1xf32, #tpu.memory_space<vmem>>) attributes {dimension_semantics = [#tpu.dimension_semantics<parallel>], iteration_bounds = array<i64: 1>, scalar_prefetch = 0 : i64, scratch_operands = 0 : i64, tpu.core_type = #tpu.core_type<tc>, window_params = [{transform_indices = @transform_0, window_bounds = array<i64: 8, 32>}, {pipeline_mode = #tpu.pipeline_mode<synchronous>, transform_indices = @transform_1, window_bounds = array<i64: 1, 32>}, {transform_indices = @transform_2, window_bounds = array<i64: 1>}, {transform_indices = @transform_3, window_bounds = array<i64: 8, 1>}]} {
    %c0 = arith.constant 0 : index
    %c0_0 = arith.constant 0 : index
    %0 = vector.load %arg1[%c0, %c0_0] : memref<8x32xf32, #tpu.memory_space<vmem>>, vector<8x32xf32>
    %c0_1 = arith.constant 0 : index
    %c0_2 = arith.constant 0 : index
    %1 = vector.load %arg2[%c0_1, %c0_2] : memref<1x32xf32, #tpu.memory_space<vmem>>, vector<1x32xf32>
    %2 = vector.broadcast %1 : vector<1x32xf32> to vector<8x32xf32>
    %3 = arith.mulf %0, %2 : vector<8x32xf32>
    %cst = arith.constant dense<0.000000e+00> : vector<8xf32>
    %4 = vector.multi_reduction <add>, %3, %cst [1] : vector<8x32xf32> to vector<8xf32>
    %5 = vector.shape_cast %4 : vector<8xf32> to vector<8x1xf32>
    %c0_3 = arith.constant 0 : index
    %6 = memref.load %arg3[%c0_3] : memref<1xf32, #tpu.memory_space<smem>>
    %7 = vector.broadcast %6 : f32 to vector<8x1xf32>
    %8 = arith.addf %5, %7 : vector<8x1xf32>
    %cst_4 = arith.constant 0.000000e+00 : f32
    %9 = vector.broadcast %cst_4 : f32 to vector<8x1xf32>
    %10 = arith.subf %9, %8 : vector<8x1xf32>
    %11 = math.exp %10 : vector<8x1xf32>
    %cst_5 = arith.constant 1.000000e+00 : f32
    %12 = vector.broadcast %cst_5 : f32 to vector<8x1xf32>
    %13 = arith.addf %12, %11 : vector<8x1xf32>
    %cst_6 = arith.constant 1.000000e+00 : f32
    %14 = vector.broadcast %cst_6 : f32 to vector<8x1xf32>
    %15 = arith.divf %14, %13 : vector<8x1xf32>
    %c0_7 = arith.constant 0 : index
    %c0_8 = arith.constant 0 : index
    %16 = vector.load %arg4[%c0_7, %c0_8] : memref<8x1xf32, #tpu.memory_space<vmem>>, vector<8x1xf32>
    tpu.vector_store %arg4[%c0_7, %c0_8], %15 {strides = array<i32>} : memref<8x1xf32, #tpu.memory_space<vmem>>, vector<8x1xf32>,
    return
  }
  func.func @transform_0(%arg0: i32) -> (i32, i32) {
    %c0_i32 = arith.constant 0 : i32
    %c0_i32_0 = arith.constant 0 : i32
    return %arg0, %c0_i32 : i32, i32
  }
  func.func @transform_1(%arg0: i32) -> (i32, i32) {
    %c0_i32 = arith.constant 0 : i32
    %c0_i32_0 = arith.constant 0 : i32
    %c0_i32_1 = arith.constant 0 : i32
    return %c0_i32, %c0_i32_0 : i32, i32
  }
  func.func @transform_2(%arg0: i32) -> i32 {
    %c0_i32 = arith.constant 0 : i32
    %c0_i32_0 = arith.constant 0 : i32
    return %c0_i32 : i32
  }
  func.func @transform_3(%arg0: i32) -> (i32, i32) {
    %c0_i32 = arith.constant 0 : i32
    %c0_i32_0 = arith.constant 0 : i32
    return %arg0, %c0_i32 : i32, i32
  }
}

</mosaic_0001>

<bundles_post_ra>
// kernel: tpu_custom_call.1
= control target key start
LH: loop header
LB: loop body
LE: loop exit
PB: predicated region body
PF: predicated region fallthrough
CT: control target
= control target key end

     0   :  { %9 = vsyncpa [#allocation4], 0  ;;  %s86_s12 = smov [#allocation3]   ;;  %s128_s0 = inlined_call_operand.hbm [shape: f32[8,32], index: 0, kind: input, shape index: {}]   ;;  %s129_s1 = inlined_call_operand.vmem [shape: f32[1,32], index: 1, kind: input, shape index: {}]   ;;  %s130_s2 = inlined_call_operand.<no memory space> [shape: f32[1], index: 2, kind: input, shape index: {}]   ;;  %s131_s3 = inlined_call_operand.vmem [shape: f32[8,1], index: 3, kind: output, shape index: {}]  }
   0x1   :  { %s16_s13 = sshll.u32 %s86_s12, 4  ;;  %s62_s16 = scalar_lea.hbm %s128_s0, 128  ;;  %s17_s13 = int_to_ptr.vmem [resolvable:$true] %s16_s13 }
   0x2   :  { %p63_p0 = scmp.ne.s32.totalorder %s128_s0, %s62_s16  ;;  %p66_p1 = scmp.lt.u32.totalorder %s62_s16, %s128_s0 }
   0x4   :  { %p68_p2 = pnand %p66_p1, %p63_p0 }
   0x6   :  { %71 = shalt.err (!%p68_p2)
}
   0x7   :  { %s72_s21 = scalar_lea.vmem %s17_s13, 128  ;;  %p77_p4 = scmp.lt.s32.totalorder %s17_s13, %s17_s13 }
   0x8   :  { %p73_p3 = scmp.ne.s32.totalorder %s17_s13, %s72_s21  ;;  %p78_p5 = scmp.lt.s32.totalorder %s72_s21, %s72_s21 }
   0xa   :  { %p79_p6 = por %p78_p5, %p77_p4 }
   0xc   :  { %p80_p7 = pnand %p79_p6, %p73_p3 }
   0xe   :  { %83 = shalt.err (!%p80_p7)
}
   0xf   :  { %19 = dma.hbm_to_vmem [thread:$0]  %s128_s0, 128, %s17_s13, [#allocation4]  }
  0x10   :  { %84 = dma.done.wait [#allocation4], 128  }
  0x11   :  { %85 = vsyncadd [#allocation4], 4294967168  ;;  %v27_v0 = vld [vmem:[#allocation3] sm:$0xff]  ;;  %vm36_vm0 = vcmask 261120   ;;  %v41_v4 = vstv %s130_s2  ;;  %vm49_vm1 = vcmask 7168  }
  0x12   :  { %v56_v1 = vld [vmem:[%s129_s1] ss:$0 sm:$0xff] }
  0x13   :  { %v35_v2 = vmul.f32 %v56_v1, %v27_v0 }
  0x15   :  { %v37_v3 = vsel %vm36_vm0, %v35_v2, 0.0 }
  0x16   :  { %38 = vadd.xlane.f32.xlu0 %v37_v3 }
  0xa3   :  { %v39_v5 = vpop.xlane.xlu0 %38 }
  0xa4   :  { %v42_v6 = vadd.f32 %v41_v4, %v39_v5 }
  0xa6   :  { %v43_v7 = vsub.f32 0.0, %v42_v6 }
  0xa8   :  { %v44_v8 = vmul.f32 1.442695, %v43_v7 }
  0xaa   :  { %58 = vpow2.f32 %v44_v8 }
  0xb4   :  { %v59_v9 = vpop.eup %58 }
  0xb5   :  { %v46_v10 = vadd.f32 1.0, %v59_v9 }
  0xb7   :  { %60 = vrcp.f32 %v46_v10 }
  0xc1   :  { %v61_v11 = vpop.eup %60 }
  0xc2   :  { %50 = vst.msk [vmem:[%s131_s3] sm:$0xff] %vm49_vm1, %v61_v11 }
  0xc3   :  { %55 = vsyncpa [#allocation4], 1 }

</bundles_post_ra>
